<compile_context>
chip_gen: v6e
topology: v6e:2x2x1
jax: 0.10.0
libtpu: 0.0.40
codegen_flags: <defaults>
</compile_context>

<pallas_src>
import jax
import jax.numpy as jnp
from jax.experimental import pallas as pl
from jax.experimental.pallas import tpu as pltpu


def coattention_kernel(
    lf_ref,      # (1, V, R)  bf16   local features, channel-major (free reshape of NCHW)
    tg_ref,      # (1, T, E)  bf16   tags embeddings
    h_ref,       # (1, 1, Hd) bf16   previous hidden state
    wh_ref,      # (Hd, V+E)  bf16   fused [W_v_h | W_a_h]
    bh_ref,      # (1, V+E)   f32    fused [b_v_h | b_a_h]
    wv_ref,      # (V, V)     bf16
    bv_ref,      # (1, V)     f32
    wvatt_ref,   # (1, V)     f32    W_v_att weight row
    wa_ref,      # (E, E)     bf16
    ba_ref,      # (1, E)     f32
    waatt_ref,   # (1, E)     f32    W_a_att weight row
    wfcv_ref,    # (V, C)     bf16   visual half of W_fc
    wfca_ref,    # (E, C)     bf16   tags half of W_fc
    bfc_ref,     # (1, C)     f32
    bvatt_ref,   # (1, 1)     f32    SMEM scalar
    baatt_ref,   # (1, 1)     f32    SMEM scalar
    ctx_ref,     # (1, 1, C)  f32
    alpha_v_ref, # (1, R, 1)  f32
    alpha_a_ref, # (1, T, 1)  f32
):
    f32 = jnp.float32
    bf16 = jnp.bfloat16
    V = wv_ref.shape[0]

    # ---------------- fused hidden-state projections ----------------
    h = h_ref[0]                                                      # (1, Hd)
    hp = jnp.dot(h, wh_ref[...], preferred_element_type=f32) + bh_ref[...]
    vh = hp[:, :V]                                                    # (1, V)
    ah = hp[:, V:]                                                    # (1, E)

    # ---------------- visual attention branch ----------------
    lf_vr = lf_ref[0]                                                 # (V, R) bf16
    # (V, R) -> (R, V): in-VMEM XLU relayout (replaces the old HBM transpose).
    lf_rv = lf_vr.astype(f32).T                                       # (R, V) f32
    lv = jnp.dot(lf_rv.astype(bf16), wv_ref[...],
                 preferred_element_type=f32) + bv_ref[...]            # (R, V)
    vi = jnp.tanh(vh + lv)                                            # (R, V) f32 (EUP)
    scores_v = (jnp.sum(vi * wvatt_ref[...], axis=1, keepdims=True)
                + bvatt_ref[0, 0])                                    # (R, 1)
    mv = jnp.max(scores_v, axis=0, keepdims=True)
    ev = jnp.exp(scores_v - mv)
    alpha_v = ev * pl.reciprocal(jnp.sum(ev, axis=0, keepdims=True), approx=True)
    alpha_v_ref[0] = alpha_v                                          # (R, 1)
    visual_out = jnp.sum(lf_rv * alpha_v, axis=0, keepdims=True)      # (1, V) f32

    # ---------------- tags attention branch ----------------
    tg = tg_ref[0]                                                    # (T, E) bf16
    la = jnp.dot(tg, wa_ref[...], preferred_element_type=f32) + ba_ref[...]
    ti = jnp.tanh(ah + la)                                            # (T, E) f32
    scores_a = (jnp.sum(ti * waatt_ref[...], axis=1, keepdims=True)
                + baatt_ref[0, 0])                                    # (T, 1)
    ma = jnp.max(scores_a, axis=0, keepdims=True)
    ea = jnp.exp(scores_a - ma)
    alpha_a = ea * pl.reciprocal(jnp.sum(ea, axis=0, keepdims=True), approx=True)
    alpha_a_ref[0] = alpha_a                                          # (T, 1)
    tags_out = jnp.sum(tg.astype(f32) * alpha_a, axis=0, keepdims=True)  # (1, E)

    # ---------------- fusion: W_fc(concat(visual_out, tags_out)) ----------------
    ctx = (jnp.dot(visual_out.astype(bf16), wfcv_ref[...], preferred_element_type=f32)
           + jnp.dot(tags_out.astype(bf16), wfca_ref[...], preferred_element_type=f32)
           + bfc_ref[...])                                            # (1, C)
    ctx_ref[0] = ctx


def init_params(key, hidden_size, embeddings_size, visual_size, context_size):
    ks = jax.random.split(key, 16)
    n = lambda k, s: (0.05 * jax.random.normal(k, s)).astype(jnp.float32)
    V, E, Hd, C = visual_size, embeddings_size, hidden_size, context_size
    return dict(
        wvh=n(ks[0], (Hd, V)),   bvh=n(ks[1], (1, V)),
        wv=n(ks[2], (V, V)),     bv=n(ks[3], (1, V)),
        wvatt=n(ks[4], (1, V)),  bvatt=n(ks[5], (1, 1)),
        wah=n(ks[6], (Hd, E)),   bah=n(ks[7], (1, E)),
        wa=n(ks[8], (E, E)),     ba=n(ks[9], (1, E)),
        waatt=n(ks[10], (1, E)), baatt=n(ks[11], (1, 1)),
        wfc_v=n(ks[12], (V, C)), wfc_a=n(ks[13], (E, C)),
        bfc=n(ks[14], (1, C)),
    )


def coattention(local_features, tags_embeddings, prev_hidden_state, params):
    """local_features: NCHW (B, V, H, W); tags_embeddings: (B, T, E); prev_hidden_state: (B, Hd)."""
    B, V, Himg, Wimg = local_features.shape
    _, T, E = tags_embeddings.shape
    Hd = prev_hidden_state.shape[-1]
    C = params["bfc"].shape[-1]
    R = Himg * Wimg
    f32, bf16 = jnp.float32, jnp.bfloat16

    # No NCHW->NHWC transpose in HBM: (B,V,H,W) -> (B,V,R) is a free reshape.
    lf = local_features.reshape(B, V, R).astype(bf16)
    tg = tags_embeddings.astype(bf16)
    h = prev_hidden_state.reshape(B, 1, Hd).astype(bf16)

    # Fused hidden projection weights (done once in the wrapper).
    wh = jnp.concatenate([params["wvh"], params["wah"]], axis=1).astype(bf16)   # (Hd, V+E)
    bh = jnp.concatenate([params["bvh"], params["bah"]], axis=1).astype(f32)    # (1, V+E)
    wv = params["wv"].astype(bf16)
    wa = params["wa"].astype(bf16)
    wfcv = params["wfc_v"].astype(bf16)
    wfca = params["wfc_a"].astype(bf16)

    args = (
        lf, tg, h,
        wh, bh,
        wv, params["bv"], params["wvatt"],
        wa, params["ba"], params["waatt"],
        wfcv, wfca, params["bfc"],
        params["bvatt"], params["baatt"],
    )

    # Weights/biases: whole-array blocks with constant index_map -> stay resident.
    resident = lambda shape: pl.BlockSpec(shape, lambda b, _s=shape: (0,) * len(_s))
    smem = pl.BlockSpec(memory_space=pltpu.MemorySpace.SMEM)

    in_specs = [
        pl.BlockSpec((1, V, R), lambda b: (b, 0, 0)),    # lf
        pl.BlockSpec((1, T, E), lambda b: (b, 0, 0)),    # tg
        pl.BlockSpec((1, 1, Hd), lambda b: (b, 0, 0)),   # h
        resident((Hd, V + E)), resident((1, V + E)),     # wh, bh
        resident((V, V)), resident((1, V)), resident((1, V)),   # wv, bv, wvatt
        resident((E, E)), resident((1, E)), resident((1, E)),   # wa, ba, waatt
        resident((V, C)), resident((E, C)), resident((1, C)),   # wfcv, wfca, bfc
        smem, smem,                                      # bvatt, baatt (scalars)
    ]
    out_specs = (
        pl.BlockSpec((1, 1, C), lambda b: (b, 0, 0)),    # context
        pl.BlockSpec((1, R, 1), lambda b: (b, 0, 0)),    # alpha_v
        pl.BlockSpec((1, T, 1), lambda b: (b, 0, 0)),    # alpha_a
    )
    out_shapes = (
        jax.ShapeDtypeStruct((B, 1, C), f32),
        jax.ShapeDtypeStruct((B, R, 1), f32),
        jax.ShapeDtypeStruct((B, T, 1), f32),
    )

    ctx, alpha_v, alpha_a = pl.pallas_call(
        coattention_kernel,
        grid=(B,),
        in_specs=in_specs,
        out_specs=out_specs,
        out_shape=out_shapes,
        compiler_params=pltpu.CompilerParams(
            dimension_semantics=("parallel",),          # megacore sharding on v7x
            # Re-derive for production shapes (v7x: 64 MiB physical VMEM).
            vmem_limit_bytes=32 * 1024 * 1024,
        ),
    )(*args)

    return ctx.reshape(B, C), alpha_v.reshape(B, R), alpha_a.reshape(B, T)


def coattention_ref(local_features, tags_embeddings, prev_hidden_state, p,
                    compute_dtype=jnp.float32):
    """Pure-JAX reference mirroring the PyTorch forward.

    compute_dtype=float32  -> exact PyTorch-semantics mirror.
    compute_dtype=bfloat16 -> mirrors the kernel's bf16 matmul-input casts
                              (f32 accumulation everywhere).
    """
    f32 = jnp.float32
    c = lambda x: x.astype(compute_dtype)
    dot = lambda a, b: jnp.dot(c(a), c(b), preferred_element_type=f32)
    B, V, H, W = local_features.shape
    lf = jnp.transpose(local_features, (0, 2, 3, 1)).reshape(B, H * W, V)
    lf = c(lf).astype(f32)
    tg = c(tags_embeddings).astype(f32)
    h = prev_hidden_state

    vi = jnp.tanh((dot(h, p["wvh"]) + p["bvh"])[:, None, :] + dot(lf, p["wv"]) + p["bv"])
    sv = jnp.sum(vi * p["wvatt"], axis=-1) + p["bvatt"][0, 0]
    av = jax.nn.softmax(sv, axis=1)
    vout = jnp.sum(lf * av[:, :, None], axis=1)

    ti = jnp.tanh((dot(h, p["wah"]) + p["bah"])[:, None, :] + dot(tg, p["wa"]) + p["ba"])
    st = jnp.sum(ti * p["waatt"], axis=-1) + p["baatt"][0, 0]
    aa = jax.nn.softmax(st, axis=1)
    tout = jnp.sum(tg * aa[:, :, None], axis=1)

    ctx = dot(vout, p["wfc_v"]) + dot(tout, p["wfc_a"]) + p["bfc"]
    return ctx, av, aa


if __name__ == "__main__":
    # small, module-consistent shapes
    B, Hd, E, V, C = 2, 32, 32, 64, 32
    Himg, Wimg, T = 4, 4, 8   # R = 16 regions, 8 tags

    key = jax.random.PRNGKey(0)
    k_lf, k_tg, k_h, k_p = jax.random.split(key, 4)
    local_features = jax.random.normal(k_lf, (B, V, Himg, Wimg), dtype=jnp.float32)
    tags_embeddings = jax.random.normal(k_tg, (B, T, E), dtype=jnp.float32)
    prev_hidden_state = jax.random.normal(k_h, (B, Hd), dtype=jnp.float32)
    params = init_params(k_p, Hd, E, V, C)

    ctx, alpha_v, alpha_a = jax.block_until_ready(
        coattention(local_features, tags_embeddings, prev_hidden_state, params)
    )
    assert ctx.shape == (B, C) and alpha_v.shape == (B, Himg * Wimg) and alpha_a.shape == (B, T)

    # 1) Matched reference (same bf16 matmul-input rounding): tight-ish check.
    ctx_m, av_m, aa_m = coattention_ref(
        local_features, tags_embeddings, prev_hidden_state, params,
        compute_dtype=jnp.bfloat16)
    assert jnp.allclose(ctx, ctx_m, atol=2e-2, rtol=2e-2)
    assert jnp.allclose(alpha_v, av_m, atol=2e-2, rtol=2e-2)
    assert jnp.allclose(alpha_a, aa_m, atol=2e-2, rtol=2e-2)

    # 2) Full-f32 PyTorch-semantics reference: end-to-end accuracy sanity bound
    #    (loosened for bf16 matmul inputs + approx softmax reciprocal).
    ctx_r, av_r, aa_r = coattention_ref(
        local_features, tags_embeddings, prev_hidden_state, params,
        compute_dtype=jnp.float32)
    assert jnp.allclose(ctx, ctx_r, atol=5e-2, rtol=5e-2)
    assert jnp.allclose(alpha_v, av_r, atol=5e-2, rtol=5e-2)
    assert jnp.allclose(alpha_a, aa_r, atol=5e-2, rtol=5e-2)

    print("KERNEL_OK")
</pallas_src>

<mosaic_0001>
module attributes {stable_mosaic.version = 11 : i64} {
  func.func @coattention_kernel(%arg0: i32, %arg1: memref<1x64x16xbf16, #tpu.memory_space<vmem>>, %arg2: memref<1x8x32xbf16, #tpu.memory_space<vmem>>, %arg3: memref<1x1x32xbf16, #tpu.memory_space<vmem>>, %arg4: memref<32x96xbf16, #tpu.memory_space<vmem>>, %arg5: memref<1x96xf32, #tpu.memory_space<vmem>>, %arg6: memref<64x64xbf16, #tpu.memory_space<vmem>>, %arg7: memref<1x64xf32, #tpu.memory_space<vmem>>, %arg8: memref<1x64xf32, #tpu.memory_space<vmem>>, %arg9: memref<32x32xbf16, #tpu.memory_space<vmem>>, %arg10: memref<1x32xf32, #tpu.memory_space<vmem>>, %arg11: memref<1x32xf32, #tpu.memory_space<vmem>>, %arg12: memref<64x32xbf16, #tpu.memory_space<vmem>>, %arg13: memref<32x32xbf16, #tpu.memory_space<vmem>>, %arg14: memref<1x32xf32, #tpu.memory_space<vmem>>, %arg15: memref<1x1xf32, #tpu.memory_space<smem>>, %arg16: memref<1x1xf32, #tpu.memory_space<smem>>, %arg17: memref<1x1x32xf32, #tpu.memory_space<vmem>>, %arg18: memref<1x16x1xf32, #tpu.memory_space<vmem>>, %arg19: memref<1x8x1xf32, #tpu.memory_space<vmem>>) attributes {dimension_semantics = [#tpu.dimension_semantics<parallel>], iteration_bounds = array<i64: 2>, scalar_prefetch = 0 : i64, scratch_operands = 0 : i64, tpu.core_type = #tpu.core_type<tc>, window_params = [{transform_indices = @transform_0, window_bounds = array<i64: 1, 64, 16>}, {transform_indices = @transform_1, window_bounds = array<i64: 1, 8, 32>}, {transform_indices = @transform_2, window_bounds = array<i64: 1, 1, 32>}, {pipeline_mode = #tpu.pipeline_mode<synchronous>, transform_indices = @transform_3, window_bounds = array<i64: 32, 96>}, {pipeline_mode = #tpu.pipeline_mode<synchronous>, transform_indices = @transform_4, window_bounds = array<i64: 1, 96>}, {pipeline_mode = #tpu.pipeline_mode<synchronous>, transform_indices = @transform_5, window_bounds = array<i64: 64, 64>}, {pipeline_mode = #tpu.pipeline_mode<synchronous>, transform_indices = @transform_6, window_bounds = array<i64: 1, 64>}, {pipeline_mode = #tpu.pipeline_mode<synchronous>, transform_indices = @transform_7, window_bounds = array<i64: 1, 64>}, {pipeline_mode = #tpu.pipeline_mode<synchronous>, transform_indices = @transform_8, window_bounds = array<i64: 32, 32>}, {pipeline_mode = #tpu.pipeline_mode<synchronous>, transform_indices = @transform_9, window_bounds = array<i64: 1, 32>}, {pipeline_mode = #tpu.pipeline_mode<synchronous>, transform_indices = @transform_10, window_bounds = array<i64: 1, 32>}, {pipeline_mode = #tpu.pipeline_mode<synchronous>, transform_indices = @transform_11, window_bounds = array<i64: 64, 32>}, {pipeline_mode = #tpu.pipeline_mode<synchronous>, transform_indices = @transform_12, window_bounds = array<i64: 32, 32>}, {pipeline_mode = #tpu.pipeline_mode<synchronous>, transform_indices = @transform_13, window_bounds = array<i64: 1, 32>}, {transform_indices = @transform_14, window_bounds = array<i64: 1, 1>}, {transform_indices = @transform_15, window_bounds = array<i64: 1, 1>}, {transform_indices = @transform_16, window_bounds = array<i64: 1, 1, 32>}, {transform_indices = @transform_17, window_bounds = array<i64: 1, 16, 1>}, {transform_indices = @transform_18, window_bounds = array<i64: 1, 8, 1>}]} {
    %c0 = arith.constant 0 : index
    %c0_0 = arith.constant 0 : index
    %c0_1 = arith.constant 0 : index
    %0 = vector.load %arg3[%c0, %c0_0, %c0_1] : memref<1x1x32xbf16, #tpu.memory_space<vmem>>, vector<1x1x32xbf16>
    %1 = vector.shape_cast %0 : vector<1x1x32xbf16> to vector<1x32xbf16>
    %c0_2 = arith.constant 0 : index
    %c0_3 = arith.constant 0 : index
    %2 = vector.load %arg4[%c0_2, %c0_3] : memref<32x96xbf16, #tpu.memory_space<vmem>>, vector<32x96xbf16>
    %cst = arith.constant dense<0.000000e+00> : vector<1x96xf32>
    %3 = tpu.matmul %1, %2, %cst {dimension_numbers = #tpu.dot_dimension_numbers<[1], [0], [0], [1], [0, 0, 1, 1], [], []>} : vector<1x32xbf16>, vector<32x96xbf16>, vector<1x96xf32> -> vector<1x96xf32>
    %c0_4 = arith.constant 0 : index
    %c0_5 = arith.constant 0 : index
    %4 = vector.load %arg5[%c0_4, %c0_5] : memref<1x96xf32, #tpu.memory_space<vmem>>, vector<1x96xf32>
    %5 = arith.addf %3, %4 : vector<1x96xf32>
    %6 = vector.extract_strided_slice %5 {offsets = [0, 0], sizes = [1, 64], strides = [1, 1]} : vector<1x96xf32> to vector<1x64xf32>
    %7 = vector.extract_strided_slice %5 {offsets = [0, 64], sizes = [1, 32], strides = [1, 1]} : vector<1x96xf32> to vector<1x32xf32>
    %c0_6 = arith.constant 0 : index
    %c0_7 = arith.constant 0 : index
    %c0_8 = arith.constant 0 : index
    %8 = vector.load %arg1[%c0_6, %c0_7, %c0_8] : memref<1x64x16xbf16, #tpu.memory_space<vmem>>, vector<1x64x16xbf16>
    %9 = vector.shape_cast %8 : vector<1x64x16xbf16> to vector<64x16xbf16>
    %10 = arith.extf %9 : vector<64x16xbf16> to vector<64x16xf32>
    %11 = tpu.transpose %10, [1, 0] : vector<64x16xf32> -> vector<16x64xf32>
    %12 = arith.truncf %11 : vector<16x64xf32> to vector<16x64xbf16>
    %c0_9 = arith.constant 0 : index
    %c0_10 = arith.constant 0 : index
    %13 = vector.load %arg6[%c0_9, %c0_10] : memref<64x64xbf16, #tpu.memory_space<vmem>>, vector<64x64xbf16>
    %cst_11 = arith.constant dense<0.000000e+00> : vector<16x64xf32>
    %14 = tpu.matmul %12, %13, %cst_11 {dimension_numbers = #tpu.dot_dimension_numbers<[1], [0], [0], [1], [0, 0, 1, 1], [], []>} : vector<16x64xbf16>, vector<64x64xbf16>, vector<16x64xf32> -> vector<16x64xf32>
    %c0_12 = arith.constant 0 : index
    %c0_13 = arith.constant 0 : index
    %15 = vector.load %arg7[%c0_12, %c0_13] : memref<1x64xf32, #tpu.memory_space<vmem>>, vector<1x64xf32>
    %16 = vector.broadcast %15 : vector<1x64xf32> to vector<16x64xf32>
    %17 = arith.addf %14, %16 : vector<16x64xf32>
    %18 = vector.broadcast %6 : vector<1x64xf32> to vector<16x64xf32>
    %19 = arith.addf %18, %17 : vector<16x64xf32>
    %20 = math.tanh %19 : vector<16x64xf32>
    %c0_14 = arith.constant 0 : index
    %c0_15 = arith.constant 0 : index
    %21 = vector.load %arg8[%c0_14, %c0_15] : memref<1x64xf32, #tpu.memory_space<vmem>>, vector<1x64xf32>
    %22 = vector.broadcast %21 : vector<1x64xf32> to vector<16x64xf32>
    %23 = arith.mulf %20, %22 : vector<16x64xf32>
    %cst_16 = arith.constant dense<0.000000e+00> : vector<16xf32>
    %24 = vector.multi_reduction <add>, %23, %cst_16 [1] : vector<16x64xf32> to vector<16xf32>
    %25 = vector.shape_cast %24 : vector<16xf32> to vector<16x1xf32>
    %c0_17 = arith.constant 0 : index
    %c0_18 = arith.constant 0 : index
    %26 = memref.load %arg15[%c0_17, %c0_18] : memref<1x1xf32, #tpu.memory_space<smem>>
    %27 = vector.broadcast %26 : f32 to vector<16x1xf32>
    %28 = arith.addf %25, %27 : vector<16x1xf32>
    %cst_19 = arith.constant dense<0xFF800000> : vector<1xf32>
    %29 = vector.multi_reduction <maximumf>, %28, %cst_19 [0] : vector<16x1xf32> to vector<1xf32>
    %30 = vector.shape_cast %29 : vector<1xf32> to vector<1x1xf32>
    %31 = vector.broadcast %30 : vector<1x1xf32> to vector<16x1xf32>
    %32 = arith.subf %28, %31 : vector<16x1xf32>
    %33 = math.exp %32 : vector<16x1xf32>
    %cst_20 = arith.constant dense<0.000000e+00> : vector<1xf32>
    %34 = vector.multi_reduction <add>, %33, %cst_20 [0] : vector<16x1xf32> to vector<1xf32>
    %35 = vector.shape_cast %34 : vector<1xf32> to vector<1x1xf32>
    %36 = tpu.reciprocal %35 {approx = true} : vector<1x1xf32> -> vector<1x1xf32>
    %37 = vector.broadcast %36 : vector<1x1xf32> to vector<16x1xf32>
    %38 = arith.mulf %33, %37 : vector<16x1xf32>
    %c0_21 = arith.constant 0 : index
    %c0_22 = arith.constant 0 : index
    %c0_23 = arith.constant 0 : index
    %39 = vector.load %arg18[%c0_21, %c0_22, %c0_23] : memref<1x16x1xf32, #tpu.memory_space<vmem>>, vector<1x16x1xf32>
    %40 = vector.shape_cast %39 : vector<1x16x1xf32> to vector<16x1xf32>
    %41 = vector.shape_cast %38 : vector<16x1xf32> to vector<1x16x1xf32>
    tpu.vector_store %arg18[%c0_21, %c0_22, %c0_23], %41 {strides = array<i32>} : memref<1x16x1xf32, #tpu.memory_space<vmem>>, vector<1x16x1xf32>,
    %42 = vector.broadcast %38 : vector<16x1xf32> to vector<16x64xf32>
    %43 = arith.mulf %11, %42 : vector<16x64xf32>
    %cst_24 = arith.constant dense<0.000000e+00> : vector<64xf32>
    %44 = vector.multi_reduction <add>, %43, %cst_24 [0] : vector<16x64xf32> to vector<64xf32>
    %45 = vector.shape_cast %44 : vector<64xf32> to vector<1x64xf32>
    %c0_25 = arith.constant 0 : index
    %c0_26 = arith.constant 0 : index
    %c0_27 = arith.constant 0 : index
    %46 = vector.load %arg2[%c0_25, %c0_26, %c0_27] : memref<1x8x32xbf16, #tpu.memory_space<vmem>>, vector<1x8x32xbf16>
    %47 = vector.shape_cast %46 : vector<1x8x32xbf16> to vector<8x32xbf16>
    %c0_28 = arith.constant 0 : index
    %c0_29 = arith.constant 0 : index
    %48 = vector.load %arg9[%c0_28, %c0_29] : memref<32x32xbf16, #tpu.memory_space<vmem>>, vector<32x32xbf16>
    %cst_30 = arith.constant dense<0.000000e+00> : vector<8x32xf32>
    %49 = tpu.matmul %47, %48, %cst_30 {dimension_numbers = #tpu.dot_dimension_numbers<[1], [0], [0], [1], [0, 0, 1, 1], [], []>} : vector<8x32xbf16>, vector<32x32xbf16>, vector<8x32xf32> -> vector<8x32xf32>
    %c0_31 = arith.constant 0 : index
    %c0_32 = arith.constant 0 : index
    %50 = vector.load %arg10[%c0_31, %c0_32] : memref<1x32xf32, #tpu.memory_space<vmem>>, vector<1x32xf32>
    %51 = vector.broadcast %50 : vector<1x32xf32> to vector<8x32xf32>
    %52 = arith.addf %49, %51 : vector<8x32xf32>
    %53 = vector.broadcast %7 : vector<1x32xf32> to vector<8x32xf32>
    %54 = arith.addf %53, %52 : vector<8x32xf32>
    %55 = math.tanh %54 : vector<8x32xf32>
    %c0_33 = arith.constant 0 : index
    %c0_34 = arith.constant 0 : index
    %56 = vector.load %arg11[%c0_33, %c0_34] : memref<1x32xf32, #tpu.memory_space<vmem>>, vector<1x32xf32>
    %57 = vector.broadcast %56 : vector<1x32xf32> to vector<8x32xf32>
    %58 = arith.mulf %55, %57 : vector<8x32xf32>
    %cst_35 = arith.constant dense<0.000000e+00> : vector<8xf32>
    %59 = vector.multi_reduction <add>, %58, %cst_35 [1] : vector<8x32xf32> to vector<8xf32>
    %60 = vector.shape_cast %59 : vector<8xf32> to vector<8x1xf32>
    %c0_36 = arith.constant 0 : index
    %c0_37 = arith.constant 0 : index
    %61 = memref.load %arg16[%c0_36, %c0_37] : memref<1x1xf32, #tpu.memory_space<smem>>
    %62 = vector.broadcast %61 : f32 to vector<8x1xf32>
    %63 = arith.addf %60, %62 : vector<8x1xf32>
    %cst_38 = arith.constant dense<0xFF800000> : vector<1xf32>
    %64 = vector.multi_reduction <maximumf>, %63, %cst_38 [0] : vector<8x1xf32> to vector<1xf32>
    %65 = vector.shape_cast %64 : vector<1xf32> to vector<1x1xf32>
    %66 = vector.broadcast %65 : vector<1x1xf32> to vector<8x1xf32>
    %67 = arith.subf %63, %66 : vector<8x1xf32>
    %68 = math.exp %67 : vector<8x1xf32>
    %cst_39 = arith.constant dense<0.000000e+00> : vector<1xf32>
    %69 = vector.multi_reduction <add>, %68, %cst_39 [0] : vector<8x1xf32> to vector<1xf32>
    %70 = vector.shape_cast %69 : vector<1xf32> to vector<1x1xf32>
    %71 = tpu.reciprocal %70 {approx = true} : vector<1x1xf32> -> vector<1x1xf32>
    %72 = vector.broadcast %71 : vector<1x1xf32> to vector<8x1xf32>
    %73 = arith.mulf %68, %72 : vector<8x1xf32>
    %c0_40 = arith.constant 0 : index
    %c0_41 = arith.constant 0 : index
    %c0_42 = arith.constant 0 : index
    %74 = vector.load %arg19[%c0_40, %c0_41, %c0_42] : memref<1x8x1xf32, #tpu.memory_space<vmem>>, vector<1x8x1xf32>
    %75 = vector.shape_cast %74 : vector<1x8x1xf32> to vector<8x1xf32>
    %76 = vector.shape_cast %73 : vector<8x1xf32> to vector<1x8x1xf32>
    tpu.vector_store %arg19[%c0_40, %c0_41, %c0_42], %76 {strides = array<i32>} : memref<1x8x1xf32, #tpu.memory_space<vmem>>, vector<1x8x1xf32>,
    %77 = arith.extf %47 : vector<8x32xbf16> to vector<8x32xf32>
    %78 = vector.broadcast %73 : vector<8x1xf32> to vector<8x32xf32>
    %79 = arith.mulf %77, %78 : vector<8x32xf32>
    %cst_43 = arith.constant dense<0.000000e+00> : vector<32xf32>
    %80 = vector.multi_reduction <add>, %79, %cst_43 [0] : vector<8x32xf32> to vector<32xf32>
    %81 = vector.shape_cast %80 : vector<32xf32> to vector<1x32xf32>
    %82 = arith.truncf %45 : vector<1x64xf32> to vector<1x64xbf16>
    %c0_44 = arith.constant 0 : index
    %c0_45 = arith.constant 0 : index
    %83 = vector.load %arg12[%c0_44, %c0_45] : memref<64x32xbf16, #tpu.memory_space<vmem>>, vector<64x32xbf16>
    %cst_46 = arith.constant dense<0.000000e+00> : vector<1x32xf32>
    %84 = tpu.matmul %82, %83, %cst_46 {dimension_numbers = #tpu.dot_dimension_numbers<[1], [0], [0], [1], [0, 0, 1, 1], [], []>} : vector<1x64xbf16>, vector<64x32xbf16>, vector<1x32xf32> -> vector<1x32xf32>
    %85 = arith.truncf %81 : vector<1x32xf32> to vector<1x32xbf16>
    %c0_47 = arith.constant 0 : index
    %c0_48 = arith.constant 0 : index
    %86 = vector.load %arg13[%c0_47, %c0_48] : memref<32x32xbf16, #tpu.memory_space<vmem>>, vector<32x32xbf16>
    %cst_49 = arith.constant dense<0.000000e+00> : vector<1x32xf32>
    %87 = tpu.matmul %85, %86, %cst_49 {dimension_numbers = #tpu.dot_dimension_numbers<[1], [0], [0], [1], [0, 0, 1, 1], [], []>} : vector<1x32xbf16>, vector<32x32xbf16>, vector<1x32xf32> -> vector<1x32xf32>
    %88 = arith.addf %84, %87 : vector<1x32xf32>
    %c0_50 = arith.constant 0 : index
    %c0_51 = arith.constant 0 : index
    %89 = vector.load %arg14[%c0_50, %c0_51] : memref<1x32xf32, #tpu.memory_space<vmem>>, vector<1x32xf32>
    %90 = arith.addf %88, %89 : vector<1x32xf32>
    %c0_52 = arith.constant 0 : index
    %c0_53 = arith.constant 0 : index
    %c0_54 = arith.constant 0 : index
    %91 = vector.load %arg17[%c0_52, %c0_53, %c0_54] : memref<1x1x32xf32, #tpu.memory_space<vmem>>, vector<1x1x32xf32>
    %92 = vector.shape_cast %91 : vector<1x1x32xf32> to vector<1x32xf32>
    %93 = vector.shape_cast %90 : vector<1x32xf32> to vector<1x1x32xf32>
    tpu.vector_store %arg17[%c0_52, %c0_53, %c0_54], %93 {strides = array<i32>} : memref<1x1x32xf32, #tpu.memory_space<vmem>>, vector<1x1x32xf32>,
    return
  }
  func.func @transform_0(%arg0: i32) -> (i32, i32, i32) {
    %c0_i32 = arith.constant 0 : i32
    %c0_i32_0 = arith.constant 0 : i32
    %c0_i32_1 = arith.constant 0 : i32
    return %arg0, %c0_i32, %c0_i32_0 : i32, i32, i32
  }
  func.func @transform_1(%arg0: i32) -> (i32, i32, i32) {
    %c0_i32 = arith.constant 0 : i32
    %c0_i32_0 = arith.constant 0 : i32
    %c0_i32_1 = arith.constant 0 : i32
    return %arg0, %c0_i32, %c0_i32_0 : i32, i32, i32
  }
  func.func @transform_2(%arg0: i32) -> (i32, i32, i32) {
    %c0_i32 = arith.constant 0 : i32
    %c0_i32_0 = arith.constant 0 : i32
    %c0_i32_1 = arith.constant 0 : i32
    return %arg0, %c0_i32, %c0_i32_0 : i32, i32, i32
  }
  func.func @transform_3(%arg0: i32) -> (i32, i32) {
    %c0_i32 = arith.constant 0 : i32
    %c0_i32_0 = arith.constant 0 : i32
    %c0_i32_1 = arith.constant 0 : i32
    return %c0_i32, %c0_i32_0 : i32, i32
  }
  func.func @transform_4(%arg0: i32) -> (i32, i32) {
    %c0_i32 = arith.constant 0 : i32
    %c0_i32_0 = arith.constant 0 : i32
    %c0_i32_1 = arith.constant 0 : i32
    return %c0_i32, %c0_i32_0 : i32, i32
  }
  func.func @transform_5(%arg0: i32) -> (i32, i32) {
    %c0_i32 = arith.constant 0 : i32
    %c0_i32_0 = arith.constant 0 : i32
    %c0_i32_1 = arith.constant 0 : i32
    return %c0_i32, %c0_i32_0 : i32, i32
  }
  func.func @transform_6(%arg0: i32) -> (i32, i32) {
    %c0_i32 = arith.constant 0 : i32
    %c0_i32_0 = arith.constant 0 : i32
    %c0_i32_1 = arith.constant 0 : i32
    return %c0_i32, %c0_i32_0 : i32, i32
  }
  func.func @transform_7(%arg0: i32) -> (i32, i32) {
    %c0_i32 = arith.constant 0 : i32
    %c0_i32_0 = arith.constant 0 : i32
    %c0_i32_1 = arith.constant 0 : i32
    return %c0_i32, %c0_i32_0 : i32, i32
  }
  func.func @transform_8(%arg0: i32) -> (i32, i32) {
    %c0_i32 = arith.constant 0 : i32
    %c0_i32_0 = arith.constant 0 : i32
    %c0_i32_1 = arith.constant 0 : i32
    return %c0_i32, %c0_i32_0 : i32, i32
  }
  func.func @transform_9(%arg0: i32) -> (i32, i32) {
    %c0_i32 = arith.constant 0 : i32
    %c0_i32_0 = arith.constant 0 : i32
    %c0_i32_1 = arith.constant 0 : i32
    return %c0_i32, %c0_i32_0 : i32, i32
  }
  func.func @transform_10(%arg0: i32) -> (i32, i32) {
    %c0_i32 = arith.constant 0 : i32
    %c0_i32_0 = arith.constant 0 : i32
    %c0_i32_1 = arith.constant 0 : i32
    return %c0_i32, %c0_i32_0 : i32, i32
  }
  func.func @transform_11(%arg0: i32) -> (i32, i32) {
    %c0_i32 = arith.constant 0 : i32
    %c0_i32_0 = arith.constant 0 : i32
    %c0_i32_1 = arith.constant 0 : i32
    return %c0_i32, %c0_i32_0 : i32, i32
  }
  func.func @transform_12(%arg0: i32) -> (i32, i32) {
    %c0_i32 = arith.constant 0 : i32
    %c0_i32_0 = arith.constant 0 : i32
    %c0_i32_1 = arith.constant 0 : i32
    return %c0_i32, %c0_i32_0 : i32, i32
  }
  func.func @transform_13(%arg0: i32) -> (i32, i32) {
    %c0_i32 = arith.constant 0 : i32
    %c0_i32_0 = arith.constant 0 : i32
    %c0_i32_1 = arith.constant 0 : i32
    return %c0_i32, %c0_i32_0 : i32, i32
  }
  func.func @transform_14(%arg0: i32) -> (i32, i32) {
    %c0_i32 = arith.constant 0 : i32
    %c0_i32_0 = arith.constant 0 : i32
    %c0_i32_1 = arith.constant 0 : i32
    return %c0_i32, %c0_i32_0 : i32, i32
  }
  func.func @transform_15(%arg0: i32) -> (i32, i32) {
    %c0_i32 = arith.constant 0 : i32
    %c0_i32_0 = arith.constant 0 : i32
    %c0_i32_1 = arith.constant 0 : i32
    return %c0_i32, %c0_i32_0 : i32, i32
  }
  func.func @transform_16(%arg0: i32) -> (i32, i32, i32) {
    %c0_i32 = arith.constant 0 : i32
    %c0_i32_0 = arith.constant 0 : i32
    %c0_i32_1 = arith.constant 0 : i32
    return %arg0, %c0_i32, %c0_i32_0 : i32, i32, i32
  }
  func.func @transform_17(%arg0: i32) -> (i32, i32, i32) {
    %c0_i32 = arith.constant 0 : i32
    %c0_i32_0 = arith.constant 0 : i32
    %c0_i32_1 = arith.constant 0 : i32
    return %arg0, %c0_i32, %c0_i32_0 : i32, i32, i32
  }
  func.func @transform_18(%arg0: i32) -> (i32, i32, i32) {
    %c0_i32 = arith.constant 0 : i32
    %c0_i32_0 = arith.constant 0 : i32
    %c0_i32_1 = arith.constant 0 : i32
    return %arg0, %c0_i32, %c0_i32_0 : i32, i32, i32
  }
}

</mosaic_0001>

<bundles_post_ra>
// kernel: tpu_custom_call.1
= control target key start
LH: loop header
LB: loop body
LE: loop exit
PB: predicated region body
PF: predicated region fallthrough
CT: control target
= control target key end

     0   :  { %s1899_s0 = inlined_call_operand.vmem [shape: bf16[2,64,16], index: 0, kind: input, shape index: {}]   ;;  %s1900_s1 = inlined_call_operand.vmem [shape: bf16[2,8,32], index: 1, kind: input, shape index: {}]   ;;  %s1901_s2 = inlined_call_operand.vmem [shape: bf16[2,1,32], index: 2, kind: input, shape index: {}]   ;;  %s1902_s3 = inlined_call_operand.vmem [shape: bf16[32,96], index: 3, kind: input, shape index: {}]   ;;  %s1903_s4 = inlined_call_operand.vmem [shape: f32[1,96], index: 4, kind: input, shape index: {}]   ;;  %s1904_s5 = inlined_call_operand.vmem [shape: bf16[64,64], index: 5, kind: input, shape index: {}]   ;;  %s1905_s6 = inlined_call_operand.vmem [shape: f32[1,64], index: 6, kind: input, shape index: {}]   ;;  %s1906_s7 = inlined_call_operand.vmem [shape: f32[1,64], index: 7, kind: input, shape index: {}]   ;;  %s1907_s8 = inlined_call_operand.vmem [shape: bf16[32,32], index: 8, kind: input, shape index: {}]   ;;  %s1908_s9 = inlined_call_operand.vmem [shape: f32[1,32], index: 9, kind: input, shape index: {}]   ;;  %s1909_s10 = inlined_call_operand.vmem [shape: f32[1,32], index: 10, kind: input, shape index: {}]   ;;  %s1910_s11 = inlined_call_operand.vmem [shape: bf16[64,32], index: 11, kind: input, shape index: {}]   ;;  %s1911_s12 = inlined_call_operand.vmem [shape: bf16[32,32], index: 12, kind: input, shape index: {}]   ;;  %s1912_s13 = inlined_call_operand.vmem [shape: f32[1,32], index: 13, kind: input, shape index: {}]   ;;  %s1913_s14 = inlined_call_operand.<no memory space> [shape: f32[1,1], index: 14, kind: input, shape index: {}]   ;;  %s1914_s15 = inlined_call_operand.<no memory space> [shape: f32[1,1], index: 15, kind: input, shape index: {}]   ;;  %s1915_s16 = inlined_call_operand.hbm [shape: f32[2,1,32], index: 16, kind: output, shape index: {0}]   ;;  %s1916_s17 = inlined_call_operand.vmem [shape: f32[2,16,1], index: 17, kind: output, shape index: {1}]   ;;  %s1917_s18 = inlined_call_operand.vmem [shape: f32[2,8,1], index: 18, kind: output, shape index: {2}]  }
   0x1   :  { %1923 = sst [smem:[#allocation12_spill]] %s1899_s0 }
   0x2   :  { %1924 = sst [smem:[#allocation13_spill]] %s1900_s1 }
   0x3   :  { %1925 = sst [smem:[#allocation14_spill]] %s1901_s2 }
   0x4   :  { %1926 = sst [smem:[#allocation15_spill]] %s1902_s3 }
   0x5   :  { %24 = sst [smem:[#allocation2]] %s1913_s14 }
   0x6   :  { %25 = sst [smem:[#allocation3]] %s1914_s15 }
   0x7   :  { %26 = vsyncpa [#allocation5], 0 }
   0x8   :  { %28 = vsyncpa [#allocation5 + $0x1], 0  ;;  %s1665_s0 = smov 0   ;;  %s1667_s19 = smov 0  }
   0x9   :  { %s1669_s1 = smov 0   ;;  %s1671_s20 = smov 0  }
   0xa LB: > { %1927 = sst [smem:[#allocation7_spill]] %s1546_s0  ;;  %s1686_s14 = sadd.s32 4294967295, %s1558_s20   ;;  %s1558_s20 = sphi %s1671_s20, %s1940_s20   ;;  %s1554_s1 = sphi %s1669_s1, %s1945_s1   ;;  %s1550_s19 = sphi %s1667_s19, %s1944_s19   ;;  %s1546_s0 = sphi %s1665_s0, %s1943_s0  }
   0xb   : > { %1928 = sst [smem:[#allocation8_spill]] %s1554_s1  ;;  %s1302_s15 = sadd.s32 4294967294, %s1558_s20  }
   0xc   : > { %s1690_s21 = sadd.s32 1, %s1558_s20   ;;  %s392_s22 = sadd.s32 1, %s1554_s1 }
   0xd   : > { %1929 = sst [smem:[#allocation9_spill]] %s1690_s21  ;;  %s389_s2 = ssub.s32 %s1558_s20, %s1690_s21 }
   0xe   : > { %p402_p0 = scmp.ne.s32.totalorder %s1554_s1, %s1550_s19  ;;  %p390_p1 = scmp.eq.s32.totalorder %s389_s2, 0 }
   0xf   : > { %p403_p2 = scmp.eq.s32.totalorder %s1686_s14, 1  ;;  %p408_p3 = scmp.ne.s32.totalorder %s1550_s19, %s1546_s0 }
  0x10   : > { %p409_p4 = scmp.eq.s32.totalorder %s1302_s15, 1  ;;  %p1305_p7 = scmp.ge.s32.totalorder %s1558_s20, 1 }
  0x11   : > { %s1701_s23 = scalar_select %p390_p1, %s1554_s1, %s392_s22  }
  0x12   : > { %p1703_p5 = por %p403_p2, %p402_p0  ;;  %p1707_p6 = por %p409_p4, %p408_p3 }
  0x13   : > { %1930 = sst [smem:[#allocation10_spill]] %s1701_s23  ;;  %p539_p8 = scmp.lt.s32.totalorder %s1558_s20, 3 }
  0x14   : > { %s1932_s25 = scalar_select %p1707_p6, 1, 0 }
  0x15   : > { %p540_p9 = pnand %p1305_p7, %p539_p8 }
  0x16   : > { %1933 = sst [smem:[#allocation11_spill]] %s1932_s25  ;;  %p608_p10 = scmp.lt.s32.totalorder (!%p540_p9), %s1686_s14, 1 }
  0x17   : > { %543 = sbr.rel (%p540_p9) target bundleno = 915 (0x393), region = 84  ;;  %s1934_s3 = sld [smem:[#allocation15_spill]] (!%p540_p9) }
  0x18   : > { %s1935_s28 = sld [smem:[#allocation14_spill]] (!%p540_p9)  ;;  %s1562_s26 = smov (!%p540_p9), 64  }
  0x19   : > { %s1936_s25 = sld [smem:[#allocation12_spill]] (!%p540_p9)  ;;  %s1335_s27 = sshll.u32 (!%p540_p9), %s1686_s14, 4 }
  0x1c   : > { %v1560_v1 = vmov 0.0   ;;  %vm1561_vm0 = vmmov 0   ;;  %s1728_s30 = scalar_select %p608_p10, %s1686_s14, 1  ;;  %vm648_vm1 = vcmask 261120   ;;  %v1472_v3 = vld [vmem:[%s1904_s5 + $0x18] sm:$0xff]   ;;  %v1470_v4 = vld [vmem:[%s1907_s8 + $0x8] sm:$0xff]   ;;  %v825_v37 = vlaneseq }
  0x1d   : > { %v1468_v0 = vld [vmem:[%s1934_s3 + $0x8] sm:$0xff]   ;;  %1378 = vmatprep.subr.bf16.mxu0 %v1560_v1  ;;  %1386 = vmatprep.subr.bf16.mxu1 %v1560_v1  ;;  %v1469_v2 = vld [vmem:[%s1934_s3] sm:$0xff]   ;;  %v1473_v7 = vld [vmem:[%s1904_s5 + $0x10] sm:$0xff]   ;;  %vm780_vm2 = vcmask 523264   ;;  %vm875_vm3 = vcmask 7168   ;;  %vm1147_vm4 = vcmask 253952  }
  0x1e   : > { %1379 = vmatpush3.bf16.msra.mxu0 %v1468_v0  ;;  %1382 = vmatprep.mubr.msk.bf16.mxu0 %vm1561_vm0, %v1560_v1  ;;  %s1338_s2 = sshll.u32 %s1728_s30, 5  ;;  %s619_s29 = scalar_lea.vmem %s1935_s28, %s1728_s30  ;;  %v1471_v9 = vld [vmem:[%s1907_s8] sm:$0xff]   ;;  %v1474_v11 = vld [vmem:[%s1904_s5 + $0x8] sm:$0xff]   ;;  %v826_v38 = vshrl.u32 %v825_v37, 7  ;;  %v1476_v0 = vld [vmem:[%s1910_s11 + $0x18] sm:$0xff]  }
  0x1f   : > { %1380 = vmatprep.subr.bf16.mxu0 %v1560_v1  ;;  %1394 = vmatprep.mubr.msk.bf16.mxu1 %vm1561_vm0, %v1560_v1  ;;  %s1744_s0 = scalar_lea.vmem %s1936_s25, %s1338_s2  ;;  %v630_v5 = vld [vmem:[%s619_s29] sm:$0x1]  ;;  %s1308_s15 = sshll.u32 %s1728_s30, 2 }
  0x20   : > { %1387 = vmatpush3.bf16.msra.mxu1 %v1472_v3  ;;  %v1341_v6 = vld [vmem:[%s1744_s0] sm:$0xff]   ;;  %s1937_s25 = sld [smem:[#allocation13_spill]]  ;;  %v1356_v12 = vld [vmem:[%s1744_s0 + $0x8] sm:$0xff]   ;;  %v1357_v17 = vld [vmem:[%s1744_s0 + $0x10] sm:$0xff]   ;;  %v827_v41 = vsub.s32 0, %v826_v38  ;;  %s1339_s29 = sshll.u32 %s1728_s30, 4 }
  0x21   : > { %1388 = vmatprep.subr.bf16.mxu1 %v1560_v1  ;;  %v1342_v8 = vunpack.c.l.bf16 %v1341_v6  ;;  %v1343_v10 = vunpack.c.h.bf16 %v1341_v6  ;;  %v1346_v14 = vunpack.c.l.bf16 %v1356_v12  ;;  %v1475_v15 = vld [vmem:[%s1904_s5] sm:$0xff]   ;;  %v1347_v16 = vunpack.c.h.bf16 %v1356_v12  ;;  %v1358_v20 = vld [vmem:[%s1744_s0 + $0x18] sm:$0xff]   ;;  %s624_s22 = scalar_lea.vmem %s1916_s17, %s1339_s29  ;;  %s1311_s3 = sshll.u32 %s1728_s30, 3 }
  0x22   : > { %1381 = vmatpush3.bf16.msra.mxu0 %v1469_v2  ;;  %v1350_v18 = vunpack.c.l.bf16 %v1357_v17  ;;  %v1351_v19 = vunpack.c.h.bf16 %v1357_v17  ;;  %v1354_v21 = vunpack.c.l.bf16 %v1358_v20  ;;  %v1355_v22 = vunpack.c.h.bf16 %v1358_v20  ;;  %v1322_v30 = vld [vmem:[%s1908_s9] ss:$0 sm:$0xff]  ;;  %v1477_v2 = vld [vmem:[%s1910_s11 + $0x10] sm:$0xff]   ;;  %s628_s23 = scalar_lea.vmem %s1917_s18, %s1311_s3  ;;  %s593_s30 = sand.u32 1, %s1550_s19  }
  0x23   : > { %1398 = vmatprep.subr.bf16.mxu0 %v1560_v1  ;;  %708 = vxpose.xlu0.b32.start [1/8] (short) (narrow) %v1342_v8, 16  ;;  %v1326_v35 = vld [vmem:[%s1909_s10] ss:$0 sm:$0xff]  ;;  %s594_s28 = scalar_lea.vmem [#allocation4], %s593_s30  ;;  %s1150_s14 = scalar_lea.sflag [#allocation5], %s593_s30 }
  0x24   : > { %1389 = vmatpush3.bf16.msra.mxu1 %v1473_v7  ;;  %v635_v39 = vld [vmem:[%s1903_s4] sm:$0x1]  ;;  %v1480_v7 = vld [vmem:[%s1911_s12 + $0x8] sm:$0xff]   ;;  %s1171_s29 = sshll.u32 %s594_s28, 4  ;;  %s1563_s3 = smov [#allocation4]   ;;  %s1860_s29 = int_to_ptr.vmem [resolvable:$true] %s1171_s29 }
  0x25   : > { %1383 = vmatmul.mubr.msk.bf16.vlgmr.msra.gmra.mxu0 %vm648_vm1, %v630_v5  ;;  %1390 = vmatprep.subr.bf16.mxu1 %v1560_v1  ;;  %v1315_v47 = vld [vmem:[%s1905_s6] ss:$0 sm:$0xff]  ;;  %v1478_v5 = vld [vmem:[%s1910_s11 + $0x8] sm:$0xff]   ;;  %s1502_s1 = sshll.u32 %s1563_s3, 4  ;;  %s1503_s1 = int_to_ptr.vmem [resolvable:$false] %s1502_s1 }
  0x26   : > { %1399 = vmatpush3.bf16.msra.mxu0 %v1470_v4  ;;  %1402 = vmatprep.mubr.msk.bf16.mxu0 %vm1561_vm0, %v1560_v1  ;;  %s616_s2 = scalar_lea.vmem %s1937_s25, %s1308_s15  ;;  %v1321_v58 = vld [vmem:[%s1906_s7] ss:$0 sm:$0xff]  ;;  %s1504_s21 = scalar_lea.vmem %s1503_s1, 32 }
  0x27   : > { %1400 = vmatprep.subr.bf16.mxu0 %v1560_v1  ;;  %v1768_v13 = vld [vmem:[%s616_s2] sm:$0xf]  ;;  %709 = vxpose.xlu0.b32.cont [2/8] (short) (narrow) %v1343_v10, 16  ;;  %s848_s2 = sld [smem:[#allocation2]]  ;;  %p1505_p0 = scmp.lt.s32.totalorder %s1860_s29, %s1503_s1 }
  0x28   : > { %1391 = vmatpush3.bf16.msra.mxu1 %v1474_v11  ;;  %v1479_v6 = vld [vmem:[%s1910_s11] sm:$0xff]  }
  0x29   : > { %1392 = vmatprep.subr.bf16.mxu1 %v1560_v1  ;;  %v1481_v8 = vld [vmem:[%s1911_s12] sm:$0xff]  }
  0x2a   : > { %1401 = vmatpush3.bf16.msra.mxu0 %v1471_v9 }
  0x2b   : > { %1406 = vmatprep.subr.bf16.mxu0 %v1560_v1  ;;  %710 = vxpose.xlu0.b32.cont [3/8] (short) (narrow) %v1346_v14, 16 }
  0x2c   : > { %1393 = vmatpush3.bf16.msra.mxu1 %v1475_v15 }
  0x2d   : > { %1403 = vmatmul.mubr.msk.bf16.vlgmr.msra.gmra.mxu0 %vm648_vm1, %v1768_v13  ;;  %1414 = vmatprep.subr.bf16.mxu1 %v1560_v1  ;;  %v849_v9 = vstv %s848_s2 }
  0x2e   : > { %1410 = vmatprep.mubr.msk.bf16.mxu0 %vm1561_vm0, %v1560_v1  ;;  %1407 = vmatpush3.bf16.msra.mxu0 %v1480_v7 }
  0x2f   : > { %711 = vxpose.xlu0.b32.cont [4/8] (short) (narrow) %v1347_v16, 16  ;;  %1408 = vmatprep.subr.bf16.mxu0 %v1560_v1 }
  0x32   : > { %1409 = vmatpush3.bf16.msra.mxu0 %v1481_v8 }
  0x33   : > { %712 = vxpose.xlu0.b32.cont [5/8] (short) (narrow) %v1350_v18, 16 }
  0x37   : > { %713 = vxpose.xlu0.b32.cont [6/8] (short) (narrow) %v1351_v19, 16 }
  0x3b   : > { %714 = vxpose.xlu0.b32.cont [7/8] (short) (narrow) %v1354_v21, 16 }
  0x3f   : > { %715 = vxpose.xlu0.b32.end [8/8] (short) (narrow) %v1355_v22, 16 }
  0x9f   : > { %v1782_v23 = vpop.trf.xlu0 }
  0xa3   : > { %v1784_v24 = vpop.trf.xlu0 }
  0xa4   : > { %v740_v25 = vpack.c.bf16 %v1784_v24, %v1782_v23 }
  0xa6   : > { %1395 = vmatmul.mubr.msk.bf16.vlgmr.msra.gmra.mxu1 %vm780_vm2, %v740_v25 }
  0xa7   : > { %1422 = vmatprep.mubr.msk.bf16.mxu1 %vm1561_vm0, %v1560_v1  ;;  %1415 = vmatpush3.bf16.msra.mxu1 %v1476_v0 }
  0xa8   : > { %1416 = vmatprep.subr.bf16.mxu1 %v1560_v1 }
  0xab   : > { %1417 = vmatpush3.bf16.msra.mxu1 %v1477_v2 }
  0xac   : > { %1418 = vmatprep.subr.bf16.mxu1 %v1560_v1 }
  0xaf   : > { %1419 = vmatpush3.bf16.msra.mxu1 %v1478_v5 }
  0xb0   : > { %1420 = vmatprep.subr.bf16.mxu1 %v1560_v1 }
  0xb3   : > { %1421 = vmatpush3.bf16.msra.mxu1 %v1479_v6 }
  0xe5   : > { %v686_v26 = vpop.f32.mrf.mxu0 }
  0xe6   : > { %v687_v40 = vadd.f32 %v686_v26, %v635_v39 }
  0xe7   : > { %v1384_v27 = vpop.f32.mrf.mxu0 }
  0xe8   : > { %v828_v42 = vrot.slane %v687_v40, %v827_v41 }
  0xe9   : > { %v689_v28 = vpop.f32.mrf.mxu0 }
  0xeb   : > { %v1385_v29 = vpop.f32.mrf.mxu0 }
  0xed   : > { %v950_v31 = vpop.f32.mrf.mxu0 }
  0xee   : > { %v951_v32 = vadd.f32 %v1322_v30, %v950_v31 }
  0xef   : > { %v1404_v33 = vpop.f32.mrf.mxu0 }
  0xf0   : > { %957 = vrot.lane.b32.xlu1 %v951_v32, %s1562_s26 }
  0xf1   : > { %v953_v34 = vpop.f32.mrf.mxu0 }
  0xf3   : > { %v1405_v36 = vpop.f32.mrf.mxu0 }
  0xf4   : > { %968 = vrot.lane.b32.xlu1 %v1326_v35, %s1562_s26 }
 0x162   : > { %v958_v43 = vpop.permute.xlu1 %957 }
 0x163   : > { %v960_v44 = vadd.f32 %v958_v43, %v828_v42 }
 0x165   : > { %1482 = vtanh.f32 %v960_v44 }
 0x166   : > { %v818_v45 = vpop.f32.mrf.mxu1  ;;  %v969_v50 = vpop.permute.xlu1 %968 }
 0x167   : > { %v819_v55 = vadd.f32 %v1315_v47, %v818_v45 }
 0x168   : > { %v1396_v46 = vpop.f32.mrf.mxu1 }
 0x169   : > { %v829_v57 = vadd.f32 %v828_v42, %v819_v55 }
 0x16a   : > { %v821_v48 = vpop.f32.mrf.mxu1 }
 0x16b   : > { %v822_v49 = vadd.f32 %v1315_v47, %v821_v48 }
 0x16c   : > { %v1397_v51 = vpop.f32.mrf.mxu1 }
 0x16d   : > { %v830_v52 = vadd.f32 %v828_v42, %v822_v49 }
 0x16f   : > { %1484 = vtanh.f32 %v830_v52 }
 0x170   : > { %1486 = vtanh.f32 %v829_v57 }
 0x172   : > { %v1483_v53 = vpop.eup %1482 }
 0x173   : > { %v971_v54 = vmul.f32 %v1483_v53, %v969_v50 }
 0x175   : > { %973 = vrot.lane.b32.xlu1 %v971_v54, %s1562_s26  ;;  %s979_s26 = sld [smem:[#allocation3]] }
 0x17b   : > { %v980_v48 = vstv %s979_s26  ;;  %s1498_s26 = scalar_lea.vmem %s1860_s29, 16 }
 0x17c   : > { %v1485_v56 = vpop.eup %1484  ;;  %p1499_p11 = scmp.ne.s32.totalorder %s1860_s29, %s1498_s26  ;;  %p1506_p1 = scmp.lt.s32.totalorder %s1504_s21, %s1498_s26 }
 0x17d   : > { %v841_v59 = vmul.f32 %v1485_v56, %v1321_v58  ;;  %v1487_v61 = vpop.eup %1486 }
 0x17e   : > { %v840_v62 = vmul.f32 %v1487_v61, %v1321_v58  ;;  %p1500_p12 = pnand %p1499_p11, %p1703_p5  ;;  %p1507_p2 = por %p1506_p1, %p1505_p0 }
 0x17f   : > { %v845_v60 = vsel %vm780_vm2, %v841_v59, 0.0 }
 0x180   : > { %846 = vadd.xlane.f32.xlu0 %v845_v60  ;;  %v842_v63 = vsel %vm780_vm2, %v840_v62, 0.0  ;;  %p1501_p13 = pneg %p1500_p12 }
 0x182   : > { %p1508_p3 = pnand %p1507_p2, %p1501_p13 }
 0x199   : > { %843 = vadd.xlane.f32.xlu1 %v842_v63 }
 0x1e7   : > { %v974_v3 = vpop.permute.xlu1 %973 }
 0x1e8   : > { %v976_v4 = vsel %vm648_vm1, %v974_v3, 0.0 }
 0x1e9   : > { %977 = vadd.xlane.f32.xlu1 %v976_v4  ;;  %v1000_v4 = vunpack.c.l.bf16 %v1768_v13 }
 0x209   : > { %v847_v10 = vpop.xlane.xlu0 %846 }
 0x20a   : > { %v851_v12 = vadd.f32 %v849_v9, %v847_v10 }
 0x222   : > { %v844_v11 = vpop.xlane.xlu1 %843 }
 0x223   : > { %v850_v14 = vadd.f32 %v849_v9, %v844_v11 }
 0x225   : > { %v852_v15 = vmax.f32 %v850_v14, %v851_v12 }
 0x227   : > { %v853_v16 = vrot.slane %v852_v15, 4 }
 0x229   : > { %v854_v17 = vmax.f32 %v852_v15, %v853_v16 }
 0x22b   : > { %v855_v18 = vrot.slane %v854_v17, 2 }
 0x22d   : > { %v856_v19 = vmax.f32 %v854_v17, %v855_v18 }
 0x22f   : > { %v857_v20 = vrot.slane %v856_v19, 1 }
 0x231   : > { %v858_v21 = vmax.f32 %v856_v19, %v857_v20 }
 0x233   : > { %v859_v22 = vsub.f32 %v850_v14, %v858_v21  ;;  %v860_v25 = vsub.f32 %v851_v12, %v858_v21  ;;  %v1145_v21 = vld [vmem:[%s1912_s13] sm:$0x1] }
 0x235   : > { %v861_v26 = vmul.f32 1.442695, %v859_v22  ;;  %v863_v27 = vmul.f32 1.442695, %v860_v25 }
 0x237   : > { %1488 = vpow2.f32 %v861_v26 }
 0x238   : > { %1490 = vpow2.f32 %v863_v27 }
 0x244   : > { %v1489_v1 = vpop.eup %1488 }
 0x245   : > { %v1491_v28 = vpop.eup %1490 }
 0x246   : > { %v865_v29 = vadd.f32 %v1491_v28, %v1489_v1 }
 0x248   : > { %v866_v30 = vrot.slane %v865_v29, 4 }
 0x24a   : > { %v867_v31 = vadd.f32 %v866_v30, %v865_v29 }
 0x24c   : > { %v868_v32 = vrot.slane %v867_v31, 2 }
 0x24e   : > { %v869_v33 = vadd.f32 %v868_v32, %v867_v31 }
 0x250   : > { %v870_v34 = vrot.slane %v869_v33, 1 }
 0x252   : > { %v871_v35 = vadd.f32 %v870_v34, %v869_v33 }
 0x254   : > { %1492 = vrcp.f32 %v871_v35 }
 0x261   : > { %v1493_v36 = vpop.eup %1492 }
 0x262   : > { %v873_v37 = vmul.f32 %v1493_v36, %v1489_v1  ;;  %v874_v38 = vmul.f32 %v1493_v36, %v1491_v28 }
 0x264   : > { %876 = vst.msk [vmem:[%s624_s22] sm:$0xff] %vm875_vm3, %v873_v37  ;;  %877 = vst.msk [vmem:[%s624_s22 + $0x8] sm:$0xff] %vm875_vm3, %v874_v38  ;;  %v878_v39 = vmul.f32 %v873_v37, %v1782_v23  ;;  %v879_v40 = vmul.f32 %v874_v38, %v1784_v24  ;;  %s1858_s22 = scalar_lea.hbm %s1915_s16, %s1335_s27 }
 0x266   : > { %v880_v41 = vsel %vm780_vm2, %v878_v39, 0.0  ;;  %v881_v42 = vsel %vm780_vm2, %v879_v40, 0.0 }
 0x267   : > { %v882_v43 = vadd.f32 %v881_v42, %v880_v41 }
 0x269   : > { %v883_v44 = vrot.slane %v882_v43, 4 }
 0x26b   : > { %v884_v45 = vadd.f32 %v883_v44, %v882_v43 }
 0x26d   : > { %v885_v46 = vrot.slane %v884_v45, 2 }
 0x26f   : > { %v886_v47 = vadd.f32 %v885_v46, %v884_v45 }
 0x271   : > { %v887_v49 = vrot.slane %v886_v47, 1 }
 0x272   : > { %v978_v50 = vpop.xlane.xlu1 %977 }
 0x273   : > { %v981_v51 = vadd.f32 %v980_v48, %v978_v50  ;;  %v888_v52 = vadd.f32 %v887_v49, %v886_v47 }
 0x275   : > { %v982_v53 = vrot.slane %v981_v51, 4  ;;  %v1009_v54 = vpack.c.bf16 %v888_v52, %v888_v52 }
 0x277   : > { %v983_v23 = vmax.f32 %v981_v51, %v982_v53  ;;  %1423 = vmatmul.mubr.msk.bf16.vlgmr.msra.gmra.mxu1 %vm780_vm2, %v1009_v54 }
 0x279   : > { %v984_v24 = vrot.slane %v983_v23, 2 }
 0x27b   : > { %v985_v55 = vmax.f32 %v983_v23, %v984_v24 }
 0x27d   : > { %v986_v56 = vrot.slane %v985_v55, 1 }
 0x27f   : > { %v987_v57 = vmax.f32 %v985_v55, %v986_v56 }
 0x281   : > { %v988_v58 = vsub.f32 %v981_v51, %v987_v57 }
 0x283   : > { %v989_v59 = vmul.f32 1.442695, %v988_v58 }
 0x285   : > { %1494 = vpow2.f32 %v989_v59 }
 0x292   : > { %v1495_v60 = vpop.eup %1494 }
 0x293   : > { %v991_v61 = vrot.slane %v1495_v60, 4 }
 0x295   : > { %v992_v62 = vadd.f32 %v1495_v60, %v991_v61 }
 0x297   : > { %v993_v63 = vrot.slane %v992_v62, 2 }
 0x299   : > { %v994_v0 = vadd.f32 %v993_v63, %v992_v62 }
 0x29b   : > { %v995_v2 = vrot.slane %v994_v0, 1 }
 0x29d   : > { %v996_v3 = vadd.f32 %v995_v2, %v994_v0 }
 0x29f   : > { %1496 = vrcp.f32 %v996_v3 }
 0x2ac   : > { %v1497_v5 = vpop.eup %1496 }
 0x2ad   : > { %v998_v6 = vmul.f32 %v1497_v5, %v1495_v60 }
 0x2af   : > { %999 = vst.msk [vmem:[%s628_s23] sm:$0xff] %vm875_vm3, %v998_v6  ;;  %v1001_v7 = vmul.f32 %v1000_v4, %v998_v6 }
 0x2b1   : > { %v1002_v8 = vsel %vm648_vm1, %v1001_v7, 0.0 }
 0x2b2   : > { %v1003_v9 = vrot.slane %v1002_v8, 4 }
 0x2b4   : > { %v1004_v10 = vadd.f32 %v1003_v9, %v1002_v8 }
 0x2b6   : > { %v1005_v11 = vrot.slane %v1004_v10, 2 }
 0x2b8   : > { %v1006_v12 = vadd.f32 %v1005_v11, %v1004_v10 }
 0x2ba   : > { %v1007_v14 = vrot.slane %v1006_v12, 1 }
 0x2bc   : > { %v1008_v15 = vadd.f32 %v1007_v14, %v1006_v12 }
 0x2be   : > { %v1018_v13 = vpack.c.bf16 %v1008_v15, %v1008_v15 }
 0x2c0   : > { %1411 = vmatmul.mubr.msk.bf16.vlgmr.msra.gmra.mxu0 %vm648_vm1, %v1018_v13 }
 0x337   : > { %v1139_v16 = vpop.f32.mrf.mxu1 }
 0x339   : > { %v1424_v17 = vpop.f32.mrf.mxu1 }
 0x33b   : > { %v1142_v18 = vpop.f32.mrf.mxu1 }
 0x33d   : > { %v1425_v19 = vpop.f32.mrf.mxu1 }
 0x380   : > { %v1072_v20 = vpop.f32.mrf.mxu0 }
 0x381   : > { %v1140_v22 = vadd.f32 %v1139_v16, %v1072_v20 }
 0x382   : > { %v1412_v25 = vpop.f32.mrf.mxu0 }
 0x383   : > { %v1146_v26 = vadd.f32 %v1145_v21, %v1140_v22 }
 0x384   : > { %v1075_v27 = vpop.f32.mrf.mxu0 }
 0x385   : > { %1148 = vst.msk [vmem:[%s594_s28] sm:$0x1] %vm1147_vm4, %v1146_v26 }
 0x386   : > { %v1413_v1 = vpop.f32.mrf.mxu0 }
 0x387   : > { %1511 = shalt.err (!%p1508_p3)
}
 0x388   : > { %s1512_s23 = scalar_lea.hbm %s1858_s22, 16  ;;  %s1516_s2 = scalar_lea.hbm %s1915_s16, 32 }
 0x389   : > { %p1513_p4 = scmp.ne.s32.totalorder %s1858_s22, %s1512_s23  ;;  %p1517_p9 = scmp.lt.s32.totalorder %s1858_s22, %s1915_s16 }
 0x38a   : > { %p1518_p10 = scmp.lt.s32.totalorder %s1516_s2, %s1512_s23 }
 0x38b   : > { %p1514_p7 = pnand %p1513_p4, %p1703_p5 }
 0x38c   : > { %p1519_p11 = por %p1518_p10, %p1517_p9 }
 0x38d   : > { %p1515_p8 = pneg %p1514_p7 }
 0x38f   : > { %p1520_p12 = pnand %p1519_p11, %p1515_p8 }
 0x391   : > { %1523 = shalt.err (!%p1520_p12)
}
 0x392   : > { %1426 = dma.vmem_to_hbm [thread:$0]  (%p1703_p5), %s1860_s29, 16, %s1858_s22, %s1150_s14  }
 0x393 PF: > { %s1938_s15 = sld [smem:[#allocation7_spill]]  ;;  %p1432_p13 = scmp.ge.s32.totalorder %s1558_s20, 2 }
 0x395   : > { %p1429_p0 = pnand %p1432_p13, %p1707_p6 }
 0x397   : > { %p1430_p1 = pneg %p1429_p0 }
 0x399   : > { %s1189_s26 = sand.u32 1, %s1938_s15  }
 0x39a   : > { %s1190_s3 = scalar_lea.sflag [#allocation5], %s1189_s26 }
 0x39b   : > { %1541 = dma.done.wait (%p1430_p1), %s1190_s3, 16  }
 0x39c   : > { %1543 = vsyncadd (%p1430_p1), %s1190_s3, 4294967280  ;;  %s1940_s20 = sld [smem:[#allocation9_spill]]  ;;  %s1943_s0 = smov %s1550_s19 }
 0x39d   : > { %s1941_s1 = sld [smem:[#allocation8_spill]] }
 0x39e   : > { %s1942_s21 = sld [smem:[#allocation10_spill]] }
 0x3a2   : > { %p31_p2 = scmp.ge.s32.totalorder %s1940_s20, 4  }
 0x3a3   : > { %s1944_s19 = smov %s1941_s1 }
 0x3a4   : > { %s1945_s1 = smov %s1942_s21  ;;  %33 = sbr.rel (!%p31_p2) target bundleno = 10 (0xa), region = 149 }
 0x3a9   :  { %1209 = vsyncpa [#allocation5], 1 }
 0x3aa   :  { %1211 = vsyncpa [#allocation5 + $0x1], 1 }

</bundles_post_ra>
